<compile_context>
chip_gen: v7x
topology: tpu7x:2x2x1
jax: 0.10.0
libtpu: 0.0.40
codegen_flags: <defaults>
</compile_context>

<pallas_src>
import jax
import jax.numpy as jnp
from jax import lax
from jax.experimental import pallas as pl
from jax.experimental.pallas import tpu as pltpu

BN_EPS = 1e-5


def _zero_linear_bn_kernel(x_ref, w_ref, g_ref, beta_ref, o_ref):
    # Linear (bias dropped: it cancels exactly under the BN mean subtraction).
    # Contract the last dims of x (N, F_in) and W (tile_fout, F_in): y = x @ W.T
    y = lax.dot_general(
        x_ref[...], w_ref[...],
        dimension_numbers=(((1,), (1,)), ((), ())),
        preferred_element_type=jnp.float32,
    )                                                     # (N, tile_fout) f32

    # BatchNorm1d, training mode: batch statistics over N, biased variance.
    mean = jnp.mean(y, axis=0, keepdims=True)             # (1, tile) XLU reduce
    centered = y - mean
    var = jnp.mean(centered * centered, axis=0, keepdims=True)
    inv_std = lax.rsqrt(var + BN_EPS)                     # EUP slot
    o_ref[...] = (g_ref[...] * (centered * inv_std) + beta_ref[...]).astype(o_ref.dtype)


def _round_up(v, m):
    return ((v + m - 1) // m) * m


def _pick_fout_tile(n, f_in_p, f_out_p, budget=8 * 1024 * 1024):
    """Largest 128-multiple F_out tile whose per-step VMEM estimate fits budget
    (conservative enough for v5e's 16 MiB scoped default / v7x's 64 MiB VMEM)."""
    for t in (1024, 512, 256, 128):
        if f_out_p % t:
            continue
        est = (n * f_in_p * 2          # x block (bf16), resident
               + 2 * t * f_in_p * 2    # weight tiles, double-buffered
               + 2 * n * t * 4         # output tiles, double-buffered
               + 2 * n * t * 4)        # f32 y / centered temporaries
        if est <= budget:
            return t
    return 128


def zero_linear_batch_norm(x, weight, bias, gamma, beta, *,
                           matmul_dtype=jnp.bfloat16):
    """Training-mode forward of ZeroLinearBatchNorm.

    x: (N, 1, F_in) f32, weight: (F_out, F_in), bias: (F_out,) [unused: it
    cancels exactly under batch normalization], gamma/beta: (F_out,).
    Returns (N, 1, F_out) f32.
    """
    del bias  # cancels in BatchNorm (mean subtraction); see header comment.
    n, one, f_in = x.shape
    assert one == 1, "module squeezes dim 1; expects (N, 1, F_in)"
    f_out = weight.shape[0]
    assert n > 1, "BatchNorm1d training stats need N > 1 (PyTorch raises too)"

    # Pad feature dims to lane-dense multiples of 128; cast MXU operands
    # (cast fuses with the pad — zero-padded rows/cols cannot change y).
    f_in_p = _round_up(f_in, 128)
    f_out_p = _round_up(f_out, 128)

    x2d = jnp.pad(x.reshape(n, f_in),
                  ((0, 0), (0, f_in_p - f_in))).astype(matmul_dtype)
    w_p = jnp.pad(weight,
                  ((0, f_out_p - f_out), (0, f_in_p - f_in))).astype(matmul_dtype)
    g_p = jnp.pad(gamma, (0, f_out_p - f_out)).reshape(1, f_out_p).astype(jnp.float32)
    b_p = jnp.pad(beta, (0, f_out_p - f_out)).reshape(1, f_out_p).astype(jnp.float32)

    tile = _pick_fout_tile(n, f_in_p, f_out_p)
    grid = (f_out_p // tile,)

    out2d = pl.pallas_call(
        _zero_linear_bn_kernel,
        out_shape=jax.ShapeDtypeStruct((n, f_out_p), jnp.float32),
        grid=grid,
        in_specs=[
            pl.BlockSpec((n, f_in_p), lambda j: (0, 0)),      # x: resident
            pl.BlockSpec((tile, f_in_p), lambda j: (j, 0)),   # weight col-block
            pl.BlockSpec((1, tile), lambda j: (0, j)),        # gamma
            pl.BlockSpec((1, tile), lambda j: (0, j)),        # beta
        ],
        out_specs=pl.BlockSpec((n, tile), lambda j: (0, j)),
        compiler_params=pltpu.CompilerParams(
            dimension_semantics=("parallel",),
            vmem_limit_bytes=32 * 1024 * 1024,
        ),
    )(x2d, w_p, g_p, b_p)

    return out2d[:, :f_out].reshape(n, 1, f_out)


def _reference(x, weight, bias, gamma, beta):
    """Pure-JAX f32 replica of the PyTorch training-mode forward."""
    n, _, f_in = x.shape
    y = x.reshape(n, f_in) @ weight.T + bias
    m = y.mean(0, keepdims=True)
    v = ((y - m) ** 2).mean(0, keepdims=True)
    return (gamma * (y - m) / jnp.sqrt(v + BN_EPS) + beta).reshape(n, 1, -1)


if __name__ == "__main__":
    key = jax.random.PRNGKey(0)
    kx, kb, kw = jax.random.split(key, 3)

    N, F_IN, F_OUT = 8, 32, 16

    x = jax.random.normal(kx, (N, 1, F_IN), dtype=jnp.float32)

    # Parameters exactly as the module's __init__ leaves them:
    #   linear.weight.fill_(0); linear.bias default uniform init;
    #   BatchNorm1d: gamma=1, beta=0.
    weight0 = jnp.zeros((F_OUT, F_IN), dtype=jnp.float32)
    bound = 1.0 / jnp.sqrt(F_IN)
    bias = jax.random.uniform(kb, (F_OUT,), jnp.float32, -bound, bound)
    gamma = jnp.ones((F_OUT,), dtype=jnp.float32)
    beta = jnp.zeros((F_OUT,), dtype=jnp.float32)

    out0 = jax.block_until_ready(
        zero_linear_batch_norm(x, weight0, bias, gamma, beta))
    ref0 = _reference(x, weight0, bias, gamma, beta)
    assert out0.shape == (N, 1, F_OUT)
    assert jnp.allclose(out0, ref0, atol=1e-5), "mismatch vs reference (zero W)"

    # Generic (non-zero) weights to exercise the matmul + BN path.  The kernel
    # feeds the MXU bf16 operands (f32 accumulate); BN renormalizes, so the
    # deviation from the full-f32 reference stays small.
    weight1 = jax.random.normal(kw, (F_OUT, F_IN), dtype=jnp.float32) * 0.1
    out1 = jax.block_until_ready(
        zero_linear_batch_norm(x, weight1, bias, gamma, beta))
    ref1 = _reference(x, weight1, bias, gamma, beta)
    assert jnp.allclose(out1, ref1, atol=5e-2), \
        f"mismatch vs reference (nonzero W): {float(jnp.max(jnp.abs(out1 - ref1)))}"

    print("KERNEL_OK")
</pallas_src>

<mosaic_0001>
module attributes {stable_mosaic.version = 11 : i64} {
  func.func @_zero_linear_bn_kernel(%arg0: i32, %arg1: memref<8x128xbf16, #tpu.memory_space<vmem>>, %arg2: memref<128x128xbf16, #tpu.memory_space<vmem>>, %arg3: memref<1x128xf32, #tpu.memory_space<vmem>>, %arg4: memref<1x128xf32, #tpu.memory_space<vmem>>, %arg5: memref<8x128xf32, #tpu.memory_space<vmem>>) attributes {dimension_semantics = [#tpu.dimension_semantics<parallel>], iteration_bounds = array<i64: 1>, scalar_prefetch = 0 : i64, scratch_operands = 0 : i64, tpu.core_type = #tpu.core_type<tc>, window_params = [{pipeline_mode = #tpu.pipeline_mode<synchronous>, transform_indices = @transform_0, window_bounds = array<i64: 8, 128>}, {transform_indices = @transform_1, window_bounds = array<i64: 128, 128>}, {transform_indices = @transform_2, window_bounds = array<i64: 1, 128>}, {transform_indices = @transform_3, window_bounds = array<i64: 1, 128>}, {transform_indices = @transform_4, window_bounds = array<i64: 8, 128>}]} {
    %c0 = arith.constant 0 : index
    %c0_0 = arith.constant 0 : index
    %0 = vector.load %arg1[%c0, %c0_0] : memref<8x128xbf16, #tpu.memory_space<vmem>>, vector<8x128xbf16>
    %c0_1 = arith.constant 0 : index
    %c0_2 = arith.constant 0 : index
    %1 = vector.load %arg2[%c0_1, %c0_2] : memref<128x128xbf16, #tpu.memory_space<vmem>>, vector<128x128xbf16>
    %cst = arith.constant dense<0.000000e+00> : vector<8x128xf32>
    %2 = tpu.matmul %0, %1, %cst {dimension_numbers = #tpu.dot_dimension_numbers<[1], [1], [0], [0], [0, 0, 1, 0], [], []>} : vector<8x128xbf16>, vector<128x128xbf16>, vector<8x128xf32> -> vector<8x128xf32>
    %cst_3 = arith.constant dense<0.000000e+00> : vector<128xf32>
    %3 = vector.multi_reduction <add>, %2, %cst_3 [0] : vector<8x128xf32> to vector<128xf32>
    %4 = vector.shape_cast %3 : vector<128xf32> to vector<1x128xf32>
    %cst_4 = arith.constant 8.000000e+00 : f32
    %5 = vector.broadcast %cst_4 : f32 to vector<1x128xf32>
    %6 = arith.divf %4, %5 : vector<1x128xf32>
    %7 = vector.broadcast %6 : vector<1x128xf32> to vector<8x128xf32>
    %8 = arith.subf %2, %7 : vector<8x128xf32>
    %9 = arith.mulf %8, %8 : vector<8x128xf32>
    %cst_5 = arith.constant dense<0.000000e+00> : vector<128xf32>
    %10 = vector.multi_reduction <add>, %9, %cst_5 [0] : vector<8x128xf32> to vector<128xf32>
    %11 = vector.shape_cast %10 : vector<128xf32> to vector<1x128xf32>
    %cst_6 = arith.constant 8.000000e+00 : f32
    %12 = vector.broadcast %cst_6 : f32 to vector<1x128xf32>
    %13 = arith.divf %11, %12 : vector<1x128xf32>
    %cst_7 = arith.constant 9.99999974E-6 : f32
    %14 = vector.broadcast %cst_7 : f32 to vector<1x128xf32>
    %15 = arith.addf %13, %14 : vector<1x128xf32>
    %16 = math.rsqrt %15 : vector<1x128xf32>
    %c0_8 = arith.constant 0 : index
    %c0_9 = arith.constant 0 : index
    %17 = vector.load %arg3[%c0_8, %c0_9] : memref<1x128xf32, #tpu.memory_space<vmem>>, vector<1x128xf32>
    %18 = vector.broadcast %16 : vector<1x128xf32> to vector<8x128xf32>
    %19 = arith.mulf %8, %18 : vector<8x128xf32>
    %20 = vector.broadcast %17 : vector<1x128xf32> to vector<8x128xf32>
    %21 = arith.mulf %20, %19 : vector<8x128xf32>
    %c0_10 = arith.constant 0 : index
    %c0_11 = arith.constant 0 : index
    %22 = vector.load %arg4[%c0_10, %c0_11] : memref<1x128xf32, #tpu.memory_space<vmem>>, vector<1x128xf32>
    %23 = vector.broadcast %22 : vector<1x128xf32> to vector<8x128xf32>
    %24 = arith.addf %21, %23 : vector<8x128xf32>
    %c0_12 = arith.constant 0 : index
    %c0_13 = arith.constant 0 : index
    %25 = vector.load %arg5[%c0_12, %c0_13] : memref<8x128xf32, #tpu.memory_space<vmem>>, vector<8x128xf32>
    tpu.vector_store %arg5[%c0_12, %c0_13], %24 {strides = array<i32>} : memref<8x128xf32, #tpu.memory_space<vmem>>, vector<8x128xf32>,
    return
  }
  func.func @transform_0(%arg0: i32) -> (i32, i32) {
    %c0_i32 = arith.constant 0 : i32
    %c0_i32_0 = arith.constant 0 : i32
    %c0_i32_1 = arith.constant 0 : i32
    return %c0_i32, %c0_i32_0 : i32, i32
  }
  func.func @transform_1(%arg0: i32) -> (i32, i32) {
    %c0_i32 = arith.constant 0 : i32
    %c0_i32_0 = arith.constant 0 : i32
    return %arg0, %c0_i32 : i32, i32
  }
  func.func @transform_2(%arg0: i32) -> (i32, i32) {
    %c0_i32 = arith.constant 0 : i32
    %c0_i32_0 = arith.constant 0 : i32
    return %c0_i32, %arg0 : i32, i32
  }
  func.func @transform_3(%arg0: i32) -> (i32, i32) {
    %c0_i32 = arith.constant 0 : i32
    %c0_i32_0 = arith.constant 0 : i32
    return %c0_i32, %arg0 : i32, i32
  }
  func.func @transform_4(%arg0: i32) -> (i32, i32) {
    %c0_i32 = arith.constant 0 : i32
    %c0_i32_0 = arith.constant 0 : i32
    return %c0_i32, %arg0 : i32, i32
  }
}

</mosaic_0001>

<bundles_post_ra>
// kernel: tpu_custom_call.1
= control target key start
LH: loop header
LB: loop body
LE: loop exit
PB: predicated region body
PF: predicated region fallthrough
CT: control target
= control target key end

     0   :  { %9 = vsyncpa [#allocation3], 0  ;;  %s412_s0 = inlined_call_operand.hbm [shape: bf16[8,128], index: 0, kind: input, shape index: {}]   ;;  %s413_s1 = inlined_call_operand.hbm [shape: bf16[128,128], index: 1, kind: input, shape index: {}]   ;;  %s414_s2 = inlined_call_operand.vmem [shape: f32[1,128], index: 2, kind: input, shape index: {}]   ;;  %s415_s3 = inlined_call_operand.vmem [shape: f32[1,128], index: 3, kind: input, shape index: {}]   ;;  %s416_s4 = inlined_call_operand.hbm [shape: f32[8,128], index: 4, kind: output, shape index: {}]  }
   0x1   :  { %10 = vsyncpa [#allocation6], 0 }
   0x2   :  { %11 = vsyncpa [#allocation4], 0  ;;  %s331_s15 = smov [#allocation2]   ;;  %s332_s17 = smov [#allocation5]  }
   0x3   :  { %s18_s16 = sshll.u32 %s331_s15, 4  ;;  %s27_s18 = sshll.u32 %s332_s17, 4  ;;  %s19_s16 = int_to_ptr.vmem [resolvable:$true] %s18_s16  ;;  %s363_s18 = int_to_ptr.vmem [resolvable:$true] %s27_s18 }
   0x4   :  { %s259_s21 = scalar_lea.hbm %s412_s0, 64 }
   0x5   :  { %p260_p0 = scmp.ne.s32.totalorder %s412_s0, %s259_s21  ;;  %p263_p1 = scmp.lt.u32.totalorder %s259_s21, %s412_s0 }
   0x7   :  { %p265_p2 = pnand %p263_p1, %p260_p0 }
   0x9   :  { %268 = shalt.err (!%p265_p2)
}
   0xa   :  { %s269_s26 = scalar_lea.vmem %s19_s16, 64  ;;  %p274_p4 = scmp.lt.s32.totalorder %s19_s16, %s19_s16 }
   0xb   :  { %p270_p3 = scmp.ne.s32.totalorder %s19_s16, %s269_s26  ;;  %p275_p5 = scmp.lt.s32.totalorder %s269_s26, %s269_s26 }
   0xd   :  { %p276_p6 = por %p275_p5, %p274_p4 }
   0xf   :  { %p277_p7 = pnand %p276_p6, %p270_p3 }
  0x11   :  { %280 = shalt.err (!%p277_p7)
}
  0x12   :  { %21 = dma.hbm_to_vmem [thread:$0]  %s412_s0, 64, %s19_s16, [#allocation3]  }
  0x13   :  { %s281_s5 = scalar_lea.hbm %s413_s1, 1024 }
  0x14   :  { %p282_p8 = scmp.ne.s32.totalorder %s413_s1, %s281_s5  ;;  %p285_p9 = scmp.lt.u32.totalorder %s281_s5, %s413_s1 }
  0x16   :  { %p287_p10 = pnand %p285_p9, %p282_p8 }
  0x18   :  { %290 = shalt.err (!%p287_p10)
}
  0x19   :  { %s291_s10 = scalar_lea.vmem %s363_s18, 1024  ;;  %p296_p12 = scmp.lt.s32.totalorder %s363_s18, %s363_s18 }
  0x1a   :  { %p292_p11 = scmp.ne.s32.totalorder %s363_s18, %s291_s10  ;;  %p297_p13 = scmp.lt.s32.totalorder %s291_s10, %s291_s10 }
  0x1c   :  { %p298_p0 = por %p297_p13, %p296_p12 }
  0x1e   :  { %p299_p1 = pnand %p298_p0, %p292_p11 }
  0x20   :  { %302 = shalt.err (!%p299_p1)
}
  0x21   :  { %s333_s0 = smov 64   ;;  %s334_s11 = smov 4  }
  0x22   :  { %33 = dma.hbm_to_vmem [thread:$0]  %s413_s1, 1024, %s363_s18, [#allocation6], %s333_s0, %s333_s0, %s334_s11  }
  0x23   :  { %325 = dma.done.wait [#allocation3], 64  }
  0x24   :  { %326 = vsyncadd [#allocation3], 4294967232 }
  0x25   :  { %327 = dma.done.wait [#allocation6], 1024  }
  0x26   :  { %328 = vsyncadd [#allocation6], 4294966272  ;;  %v335_v0 = vmov 0.0   ;;  %vm336_vm0 = vmmov 0   ;;  %v249_v1 = vld [vmem:[#allocation5] sm:$0xff]   ;;  %v250_v2 = vld [vmem:[#allocation5 + $0x8] sm:$0xff]  }
  0x27   :  { %222 = vmatprep.subr.bf16.mxu0 %v335_v0  ;;  %238 = vmatprep.mubr.msk.bf16.mxu0 %vm336_vm0, %v335_v0  ;;  %v251_v3 = vld [vmem:[#allocation5 + $0x10] sm:$0xff]   ;;  %v252_v4 = vld [vmem:[#allocation5 + $0x18] sm:$0xff]   ;;  %v253_v5 = vld [vmem:[#allocation5 + $0x20] sm:$0xff]   ;;  %s337_s17 = smov [#allocation7]  }
  0x28   :  { %223 = vmatpush3.bf16.xpose.msra.mxu0 %v249_v1  ;;  %v254_v6 = vld [vmem:[#allocation5 + $0x28] sm:$0xff]   ;;  %v255_v7 = vld [vmem:[#allocation5 + $0x30] sm:$0xff]   ;;  %v256_v8 = vld [vmem:[#allocation5 + $0x38] sm:$0xff]   ;;  %s193_s18 = sshll.u32 %s337_s17, 4  ;;  %s194_s18 = int_to_ptr.vmem [resolvable:$true] %s193_s18 }
  0x29   :  { %224 = vmatprep.subr.bf16.mxu0 %v335_v0  ;;  %v45_v9 = vld [vmem:[#allocation2] sm:$0xf]  ;;  %s303_s19 = scalar_lea.vmem %s194_s18, 128  ;;  %p308_p3 = scmp.lt.s32.totalorder %s194_s18, %s194_s18 }
  0x2a   :  { %v211_v32 = vld [vmem:[%s414_s2] ss:$0 sm:$0xff]  ;;  %p304_p2 = scmp.ne.s32.totalorder %s194_s18, %s303_s19  ;;  %p309_p4 = scmp.lt.s32.totalorder %s303_s19, %s303_s19 }
  0x2b   :  { %v212_v34 = vld [vmem:[%s415_s3] ss:$0 sm:$0xff] }
  0x2c   :  { %p310_p5 = por %p309_p4, %p308_p3 }
  0x2e   :  { %p311_p6 = pnand %p310_p5, %p304_p2 }
  0x30   :  { %225 = vmatpush3.bf16.xpose.msra.mxu0 %v250_v2 }
  0x31   :  { %226 = vmatprep.subr.bf16.mxu0 %v335_v0 }
  0x38   :  { %227 = vmatpush3.bf16.xpose.msra.mxu0 %v251_v3 }
  0x39   :  { %228 = vmatprep.subr.bf16.mxu0 %v335_v0 }
  0x40   :  { %229 = vmatpush3.bf16.xpose.msra.mxu0 %v252_v4 }
  0x41   :  { %230 = vmatprep.subr.bf16.mxu0 %v335_v0 }
  0x48   :  { %231 = vmatpush3.bf16.xpose.msra.mxu0 %v253_v5 }
  0x49   :  { %232 = vmatprep.subr.bf16.mxu0 %v335_v0 }
  0x50   :  { %233 = vmatpush3.bf16.xpose.msra.mxu0 %v254_v6 }
  0x51   :  { %234 = vmatprep.subr.bf16.mxu0 %v335_v0 }
  0x58   :  { %235 = vmatpush3.bf16.xpose.msra.mxu0 %v255_v7 }
  0x59   :  { %236 = vmatprep.subr.bf16.mxu0 %v335_v0 }
  0x60   :  { %237 = vmatpush3.bf16.xpose.msra.mxu0 %v256_v8 }
  0x67   :  { %239 = vmatmul.mubr.bf16.vlgmr.msra.gmra.mrb[0].mxu0 %v45_v9 }
 0x13a   :  { %v144_v10 = vpop.f32.mrb[0].mxu0 }
 0x13b   :  { %v150_v11 = vrot.slane %v144_v10, 4  ;;  %v240_v12 = vpop.f32.mrb[1].mxu0 }
 0x13c   :  { %v147_v13 = vpop.f32.mrb[2].mxu0 }
 0x13d   :  { %v151_v14 = vadd.f32 %v150_v11, %v144_v10  ;;  %v241_v15 = vpop.f32.mrb[3].mxu0 }
 0x13f   :  { %v152_v16 = vrot.slane %v151_v14, 2 }
 0x141   :  { %v153_v17 = vadd.f32 %v152_v16, %v151_v14 }
 0x143   :  { %v154_v18 = vrot.slane %v153_v17, 1 }
 0x145   :  { %v155_v19 = vadd.f32 %v154_v18, %v153_v17 }
 0x147   :  { %v157_v20 = vmul.f32 0.125, %v155_v19 }
 0x149   :  { %v158_v21 = vsub.f32 %v144_v10, %v157_v20 }
 0x14b   :  { %v159_v22 = vmul.f32 %v158_v21, %v158_v21 }
 0x14d   :  { %v160_v23 = vrot.slane %v159_v22, 4 }
 0x14f   :  { %v161_v24 = vadd.f32 %v160_v23, %v159_v22 }
 0x151   :  { %v162_v25 = vrot.slane %v161_v24, 2 }
 0x153   :  { %v163_v26 = vadd.f32 %v162_v25, %v161_v24 }
 0x155   :  { %v164_v27 = vrot.slane %v163_v26, 1 }
 0x157   :  { %v165_v28 = vadd.f32 %v164_v27, %v163_v26 }
 0x159   :  { %v166_v29 = vmul.f32 0.125, %v165_v28 }
 0x15b   :  { %v167_v30 = vadd.f32 1e-05, %v166_v29 }
 0x15d   :  { %257 = vrsqrt.f32 %v167_v30 }
 0x167   :  { %v258_v31 = vpop.eup %257 }
 0x168   :  { %v170_v33 = vmul.f32 %v258_v31, %v158_v21 }
 0x16a   :  { %v177_v35 = vmul.f32 %v211_v32, %v170_v33 }
 0x16c   :  { %v185_v36 = vadd.f32 %v212_v34, %v177_v35 }
 0x16e   :  { %186 = vst [vmem:[#allocation7] sm:$0xff] %v185_v36 }
 0x16f   :  { %314 = shalt.err (!%p311_p6)
}
 0x170   :  { %s315_s21 = scalar_lea.hbm %s416_s4, 128 }
 0x171   :  { %p316_p7 = scmp.ne.s32.totalorder %s416_s4, %s315_s21  ;;  %p319_p8 = scmp.lt.u32.totalorder %s315_s21, %s416_s4 }
 0x173   :  { %p321_p9 = pnand %p319_p8, %p316_p7 }
 0x175   :  { %324 = shalt.err (!%p321_p9)
}
 0x176   :  { %196 = dma.vmem_to_hbm [thread:$0]  %s194_s18, 128, %s416_s4, [#allocation4]  }
 0x177   :  { %329 = dma.done.wait [#allocation4], 128  }
 0x178   :  { %330 = vsyncadd [#allocation4], 4294967168 }
 0x179   :  { %200 = vsyncpa [#allocation3], 1 }
 0x17a   :  { %201 = vsyncpa [#allocation6], 1 }
 0x17b   :  { %202 = vsyncpa [#allocation4], 1 }

</bundles_post_ra>
